<compile_context>
chip_gen: v7x
topology: tpu7x:2x2x1
jax: 0.10.0
libtpu: 0.0.40
codegen_flags: <defaults>
</compile_context>

<pallas_src>
import functools

import jax
import jax.numpy as jnp
from jax.experimental import pallas as pl
from jax.experimental.pallas import tpu as pltpu


def _round_up(v, m):
    return (v + m - 1) // m * m


def _conv_bn_relu_kernel(x_ref, w_ref, b_ref, o_ref, xpad_ref, col_ref, *,
                         kh, kw, h_in, w_in, pad, w_padded, w_out,
                         c_blk, apply_relu):
    """One grid step = one batch element.

    x_ref:    (1, Cin, H*W)           un-padded input image, dense lanes
    w_ref:    (Cout, KH*KW*c_blk)     packed conv weight, BN scale folded,
                                      zero columns in the per-tap pad rows
    b_ref:    (Cout, 1)               folded BN (+conv) bias, f32
    o_ref:    (1, Cout, Hout*Wout)    final dense NCHW output block
    xpad_ref: (c_blk, Hstore*Wp)      zero-padded staging image (VMEM)
    col_ref:  (KH*KW*c_blk, Hout*Wp)  im2col scratch (VMEM, compute dtype)
    """
    c_in = x_ref.shape[1]
    hw_wide = col_ref.shape[1]
    h_out = hw_wide // w_padded

    # Zero the staging buffer: pad borders, the extra bottom row and the
    # Cin..c_blk alignment rows must read as exact zeros.  Done every step so
    # correctness does not depend on which TensorCore runs which grid index.
    xpad_ref[...] = jnp.zeros_like(xpad_ref)

    # In-kernel zero padding: copy the interior rows into the flattened
    # padded layout (replaces the wrapper jnp.pad pass).
    for r in range(h_in):
        dst = (r + pad) * w_padded + pad
        xpad_ref[:c_in, dst:dst + w_in] = (
            x_ref[0, :, r * w_in:(r + 1) * w_in].astype(xpad_ref.dtype))

    # im2col: on the flattened padded image every conv tap (i, j) is a pure
    # lane shift of i*Wp + j -- one contiguous, 8-sublane-aligned block copy
    # (the alignment rows of xpad carry the zeros for the padded K entries).
    for i in range(kh):
        for j in range(kw):
            tap = i * kw + j
            shift = i * w_padded + j
            col_ref[tap * c_blk:(tap + 1) * c_blk, :] = (
                xpad_ref[:, shift:shift + hw_wide])

    # One MXU dot (K = KH*KW*c_blk); operands stay in compute dtype (native
    # bf16 matmul when compute_dtype=bf16); accumulation is f32.
    acc = jnp.dot(w_ref[...], col_ref[...],
                  preferred_element_type=jnp.float32)

    y = acc + b_ref[...]                       # folded BN bias (f32)
    if apply_relu:
        y = jnp.maximum(y, 0.0)
    y = y.astype(o_ref.dtype)

    # Compact Wp -> Wout inside the kernel so the output block (and the HBM
    # writeback) is already dense -- no wrapper slice pass.
    if w_out == w_padded:
        o_ref[0] = y
    else:
        for r in range(h_out):
            o_ref[0, :, r * w_out:(r + 1) * w_out] = (
                y[:, r * w_padded:r * w_padded + w_out])


def basic_conv(x, weight, bn_gamma=None, bn_beta=None, bn_mean=None,
               bn_var=None, conv_bias=None, *, stride=1, padding=0,
               dilation=1, groups=1, relu=True, bn=True, eps=1e-5,
               compute_dtype=jnp.float32, out_dtype=jnp.float32,
               vmem_limit_bytes=None):
    """Pallas implementation of BasicConv.forward (inference mode).

    x:      (N, Cin, H, W)  NCHW (PyTorch convention), any float dtype
    weight: (Cout, Cin, KH, KW)  (PyTorch conv weight layout)
    """
    assert stride == 1 and dilation == 1 and groups == 1, \
        "only stride=1, dilation=1, groups=1 implemented"

    n, c_in, h, w = x.shape
    c_out, c_in_w, kh, kw = weight.shape
    assert c_in_w == c_in

    w_padded = w + 2 * padding
    h_padded = h + 2 * padding
    h_out = h_padded - kh + 1
    w_out = w_padded - kw + 1
    h_store = h_padded + 1            # +1 zero row keeps every tap shift in-bounds
    hw_wide = h_out * w_padded
    hw_out = h_out * w_out
    c_blk = max(_round_up(c_in, 8), 8)   # 8-sublane-aligned per-tap row block
    k_pad = kh * kw * c_blk

    # ---- fold BN into weight / bias (tiny, f32, wrapper-side) --------------
    if bn:
        scale = (bn_gamma.astype(jnp.float32) /
                 jnp.sqrt(bn_var.astype(jnp.float32) + eps))
        bias = bn_beta.astype(jnp.float32) - bn_mean.astype(jnp.float32) * scale
    else:
        scale = jnp.ones((c_out,), jnp.float32)
        bias = jnp.zeros((c_out,), jnp.float32)
    if conv_bias is not None:
        bias = bias + conv_bias.astype(jnp.float32) * scale

    # Pack weight as (Cout, KH*KW*c_blk) in (kh, kw, cin[+pad]) order to match
    # the in-kernel im2col layout; padded channel columns are zero.
    w_eff = weight.astype(jnp.float32) * scale[:, None, None, None]
    w_perm = jnp.transpose(w_eff, (0, 2, 3, 1))              # (Cout, KH, KW, Cin)
    w_perm = jnp.pad(w_perm, ((0, 0), (0, 0), (0, 0), (0, c_blk - c_in)))
    w_packed = w_perm.reshape(c_out, k_pad).astype(compute_dtype)
    bias2d = bias.reshape(c_out, 1).astype(jnp.float32)

    # Input stays in its own dtype (the in-kernel staging copy casts to
    # compute_dtype), so there is no extra wrapper pass over x at all.
    x_flat = x.reshape(n, c_in, h * w)                       # free reshape

    # ---- explicit scoped-VMEM budget ----------------------------------------
    if vmem_limit_bytes is None:
        def _buf_bytes(rows, cols, itemsize):
            sub = 8 * (4 // itemsize)      # (8,128) f32 tiles, (16,128) bf16 tiles
            return _round_up(rows, sub) * _round_up(max(cols, 1), 128) * itemsize
        cd_b = jnp.dtype(compute_dtype).itemsize
        od_b = jnp.dtype(out_dtype).itemsize
        est = (2 * _buf_bytes(c_in, h * w, x.dtype.itemsize)        # x, 2-buffered
               + 2 * _buf_bytes(c_out, k_pad, cd_b)                 # weight
               + 2 * _buf_bytes(c_out, 1, 4)                        # bias
               + 2 * _buf_bytes(c_out, hw_out, od_b)                # out, 2-buffered
               + _buf_bytes(c_blk, h_store * w_padded, cd_b)        # xpad scratch
               + _buf_bytes(k_pad, hw_wide, cd_b))                  # col scratch
        vmem_limit_bytes = min(max(2 * est + (4 << 20), 32 << 20), 56 << 20)

    kernel = functools.partial(
        _conv_bn_relu_kernel, kh=kh, kw=kw, h_in=h, w_in=w, pad=padding,
        w_padded=w_padded, w_out=w_out, c_blk=c_blk, apply_relu=relu)

    out_flat = pl.pallas_call(
        kernel,
        out_shape=jax.ShapeDtypeStruct((n, c_out, hw_out), out_dtype),
        grid_spec=pltpu.PrefetchScalarGridSpec(
            num_scalar_prefetch=0,
            grid=(n,),
            in_specs=[
                pl.BlockSpec((1, c_in, h * w), lambda b: (b, 0, 0)),
                pl.BlockSpec((c_out, k_pad), lambda b: (0, 0)),
                pl.BlockSpec((c_out, 1), lambda b: (0, 0)),
            ],
            out_specs=pl.BlockSpec((1, c_out, hw_out), lambda b: (b, 0, 0)),
            scratch_shapes=[
                pltpu.VMEM((c_blk, h_store * w_padded), compute_dtype),
                pltpu.VMEM((k_pad, hw_wide), compute_dtype),
            ],
        ),
        compiler_params=pltpu.CompilerParams(
            dimension_semantics=("parallel",),
            vmem_limit_bytes=vmem_limit_bytes),
    )(x_flat, w_packed, bias2d)

    return out_flat.reshape(n, c_out, h_out, w_out)         # free reshape


def _reference(x, weight, gamma, beta, mean, var, *, padding, relu, eps=1e-5):
    """Pure-JAX reference (lax conv) for the correctness check."""
    y = jax.lax.conv_general_dilated(
        x, weight, window_strides=(1, 1),
        padding=[(padding, padding), (padding, padding)],
        dimension_numbers=("NCHW", "OIHW", "NCHW"),
        precision=jax.lax.Precision.HIGHEST)
    scale = gamma / jnp.sqrt(var + eps)
    bias = beta - mean * scale
    y = y * scale[None, :, None, None] + bias[None, :, None, None]
    if relu:
        y = jnp.maximum(y, 0.0)
    return y


if __name__ == "__main__":
    # BasicConv(in_planes=4, out_planes=8, kernel_size=3, stride=1, padding=1)
    N, C_IN, H, W = 2, 4, 16, 16
    C_OUT, K = 8, 3
    PADDING = 1
    EPS = 1e-5

    key = jax.random.PRNGKey(0)
    k_x, k_w, k_g, k_b, k_m, k_v = jax.random.split(key, 6)

    x = jax.random.normal(k_x, (N, C_IN, H, W), dtype=jnp.float32)
    weight = jax.random.normal(k_w, (C_OUT, C_IN, K, K), dtype=jnp.float32) * 0.1
    bn_gamma = 1.0 + 0.1 * jax.random.normal(k_g, (C_OUT,), dtype=jnp.float32)
    bn_beta = 0.1 * jax.random.normal(k_b, (C_OUT,), dtype=jnp.float32)
    bn_mean = 0.1 * jax.random.normal(k_m, (C_OUT,), dtype=jnp.float32)
    bn_var = jnp.abs(1.0 + 0.1 * jax.random.normal(k_v, (C_OUT,),
                                                   dtype=jnp.float32))

    # ---- f32 path: check against the lax reference --------------------------
    out = basic_conv(x, weight, bn_gamma, bn_beta, bn_mean, bn_var,
                     stride=1, padding=PADDING, relu=True, bn=True, eps=EPS)
    out = jax.block_until_ready(out)
    ref = _reference(x, weight, bn_gamma, bn_beta, bn_mean, bn_var,
                     padding=PADDING, relu=True, eps=EPS)
    assert out.shape == (N, C_OUT, H, W), out.shape
    assert jnp.allclose(out, ref, atol=1e-4, rtol=1e-4), \
        float(jnp.max(jnp.abs(out - ref)))

    # ---- bf16 operands + bf16 output path ------------------------------------
    # Reference uses the same bf16-rounded x and (BN-folded) weight so the
    # remaining error is accumulation order + bf16 output rounding.
    out_bf = basic_conv(x, weight, bn_gamma, bn_beta, bn_mean, bn_var,
                        stride=1, padding=PADDING, relu=True, bn=True, eps=EPS,
                        compute_dtype=jnp.bfloat16, out_dtype=jnp.bfloat16)
    out_bf = jax.block_until_ready(out_bf)
    assert out_bf.dtype == jnp.bfloat16, out_bf.dtype
    assert out_bf.shape == (N, C_OUT, H, W), out_bf.shape

    scale_f = bn_gamma / jnp.sqrt(bn_var + EPS)
    bias_f = bn_beta - bn_mean * scale_f
    w_eff_bf = (weight * scale_f[:, None, None, None]
                ).astype(jnp.bfloat16).astype(jnp.float32)
    x_bf = x.astype(jnp.bfloat16).astype(jnp.float32)
    ref_bf = jax.lax.conv_general_dilated(
        x_bf, w_eff_bf, window_strides=(1, 1),
        padding=[(PADDING, PADDING), (PADDING, PADDING)],
        dimension_numbers=("NCHW", "OIHW", "NCHW"),
        precision=jax.lax.Precision.HIGHEST)
    ref_bf = jnp.maximum(ref_bf + bias_f[None, :, None, None], 0.0)
    assert jnp.allclose(out_bf.astype(jnp.float32), ref_bf,
                        atol=3e-2, rtol=3e-2), \
        float(jnp.max(jnp.abs(out_bf.astype(jnp.float32) - ref_bf)))

    print("KERNEL_OK")
</pallas_src>

<mosaic_0001>
module attributes {stable_mosaic.version = 11 : i64} {
  func.func @_conv_bn_relu_kernel(%arg0: i32, %arg1: memref<1x4x256xf32, #tpu.memory_space<vmem>>, %arg2: memref<8x72xf32, #tpu.memory_space<vmem>>, %arg3: memref<8x1xf32, #tpu.memory_space<vmem>>, %arg4: memref<1x8x256xf32, #tpu.memory_space<vmem>>, %arg5: memref<8x342xf32, #tpu.memory_space<vmem>>, %arg6: memref<72x288xf32, #tpu.memory_space<vmem>>) attributes {dimension_semantics = [#tpu.dimension_semantics<parallel>], iteration_bounds = array<i64: 2>, scalar_prefetch = 0 : i64, scratch_operands = 2 : i64, tpu.core_type = #tpu.core_type<tc>, window_params = [{transform_indices = @transform_0, window_bounds = array<i64: 1, 4, 256>}, {pipeline_mode = #tpu.pipeline_mode<synchronous>, transform_indices = @transform_1, window_bounds = array<i64: 8, 72>}, {pipeline_mode = #tpu.pipeline_mode<synchronous>, transform_indices = @transform_2, window_bounds = array<i64: 8, 1>}, {transform_indices = @transform_3, window_bounds = array<i64: 1, 8, 256>}]} {
    %cst = arith.constant 0.000000e+00 : f32
    %0 = vector.broadcast %cst : f32 to vector<8x342xf32>
    %c0 = arith.constant 0 : index
    %c0_0 = arith.constant 0 : index
    %1 = vector.load %arg5[%c0, %c0_0] : memref<8x342xf32, #tpu.memory_space<vmem>>, vector<8x342xf32>
    tpu.vector_store %arg5[%c0, %c0_0], %0 {strides = array<i32>} : memref<8x342xf32, #tpu.memory_space<vmem>>, vector<8x342xf32>,
    %c0_1 = arith.constant 0 : index
    %c0_2 = arith.constant 0 : index
    %c0_3 = arith.constant 0 : index
    %2 = vector.load %arg1[%c0_1, %c0_2, %c0_3] : memref<1x4x256xf32, #tpu.memory_space<vmem>>, vector<1x4x16xf32>
    %3 = vector.shape_cast %2 : vector<1x4x16xf32> to vector<4x16xf32>
    %c0_4 = arith.constant 0 : index
    %c19 = arith.constant 19 : index
    %4 = vector.load %arg5[%c0_4, %c19] : memref<8x342xf32, #tpu.memory_space<vmem>>, vector<4x16xf32>
    tpu.vector_store %arg5[%c0_4, %c19], %3 {strides = array<i32>} : memref<8x342xf32, #tpu.memory_space<vmem>>, vector<4x16xf32>,
    %c0_5 = arith.constant 0 : index
    %c0_6 = arith.constant 0 : index
    %c16 = arith.constant 16 : index
    %5 = vector.load %arg1[%c0_5, %c0_6, %c16] : memref<1x4x256xf32, #tpu.memory_space<vmem>>, vector<1x4x16xf32>
    %6 = vector.shape_cast %5 : vector<1x4x16xf32> to vector<4x16xf32>
    %c0_7 = arith.constant 0 : index
    %c37 = arith.constant 37 : index
    %7 = vector.load %arg5[%c0_7, %c37] : memref<8x342xf32, #tpu.memory_space<vmem>>, vector<4x16xf32>
    tpu.vector_store %arg5[%c0_7, %c37], %6 {strides = array<i32>} : memref<8x342xf32, #tpu.memory_space<vmem>>, vector<4x16xf32>,
    %c0_8 = arith.constant 0 : index
    %c0_9 = arith.constant 0 : index
    %c32 = arith.constant 32 : index
    %8 = vector.load %arg1[%c0_8, %c0_9, %c32] : memref<1x4x256xf32, #tpu.memory_space<vmem>>, vector<1x4x16xf32>
    %9 = vector.shape_cast %8 : vector<1x4x16xf32> to vector<4x16xf32>
    %c0_10 = arith.constant 0 : index
    %c55 = arith.constant 55 : index
    %10 = vector.load %arg5[%c0_10, %c55] : memref<8x342xf32, #tpu.memory_space<vmem>>, vector<4x16xf32>
    tpu.vector_store %arg5[%c0_10, %c55], %9 {strides = array<i32>} : memref<8x342xf32, #tpu.memory_space<vmem>>, vector<4x16xf32>,
    %c0_11 = arith.constant 0 : index
    %c0_12 = arith.constant 0 : index
    %c48 = arith.constant 48 : index
    %11 = vector.load %arg1[%c0_11, %c0_12, %c48] : memref<1x4x256xf32, #tpu.memory_space<vmem>>, vector<1x4x16xf32>
    %12 = vector.shape_cast %11 : vector<1x4x16xf32> to vector<4x16xf32>
    %c0_13 = arith.constant 0 : index
    %c73 = arith.constant 73 : index
    %13 = vector.load %arg5[%c0_13, %c73] : memref<8x342xf32, #tpu.memory_space<vmem>>, vector<4x16xf32>
    tpu.vector_store %arg5[%c0_13, %c73], %12 {strides = array<i32>} : memref<8x342xf32, #tpu.memory_space<vmem>>, vector<4x16xf32>,
    %c0_14 = arith.constant 0 : index
    %c0_15 = arith.constant 0 : index
    %c64 = arith.constant 64 : index
    %14 = vector.load %arg1[%c0_14, %c0_15, %c64] : memref<1x4x256xf32, #tpu.memory_space<vmem>>, vector<1x4x16xf32>
    %15 = vector.shape_cast %14 : vector<1x4x16xf32> to vector<4x16xf32>
    %c0_16 = arith.constant 0 : index
    %c91 = arith.constant 91 : index
    %16 = vector.load %arg5[%c0_16, %c91] : memref<8x342xf32, #tpu.memory_space<vmem>>, vector<4x16xf32>
    tpu.vector_store %arg5[%c0_16, %c91], %15 {strides = array<i32>} : memref<8x342xf32, #tpu.memory_space<vmem>>, vector<4x16xf32>,
    %c0_17 = arith.constant 0 : index
    %c0_18 = arith.constant 0 : index
    %c80 = arith.constant 80 : index
    %17 = vector.load %arg1[%c0_17, %c0_18, %c80] : memref<1x4x256xf32, #tpu.memory_space<vmem>>, vector<1x4x16xf32>
    %18 = vector.shape_cast %17 : vector<1x4x16xf32> to vector<4x16xf32>
    %c0_19 = arith.constant 0 : index
    %c109 = arith.constant 109 : index
    %19 = vector.load %arg5[%c0_19, %c109] : memref<8x342xf32, #tpu.memory_space<vmem>>, vector<4x16xf32>
    tpu.vector_store %arg5[%c0_19, %c109], %18 {strides = array<i32>} : memref<8x342xf32, #tpu.memory_space<vmem>>, vector<4x16xf32>,
    %c0_20 = arith.constant 0 : index
    %c0_21 = arith.constant 0 : index
    %c96 = arith.constant 96 : index
    %20 = vector.load %arg1[%c0_20, %c0_21, %c96] : memref<1x4x256xf32, #tpu.memory_space<vmem>>, vector<1x4x16xf32>
    %21 = vector.shape_cast %20 : vector<1x4x16xf32> to vector<4x16xf32>
    %c0_22 = arith.constant 0 : index
    %c127 = arith.constant 127 : index
    %22 = vector.load %arg5[%c0_22, %c127] : memref<8x342xf32, #tpu.memory_space<vmem>>, vector<4x16xf32>
    tpu.vector_store %arg5[%c0_22, %c127], %21 {strides = array<i32>} : memref<8x342xf32, #tpu.memory_space<vmem>>, vector<4x16xf32>,
    %c0_23 = arith.constant 0 : index
    %c0_24 = arith.constant 0 : index
    %c112 = arith.constant 112 : index
    %23 = vector.load %arg1[%c0_23, %c0_24, %c112] : memref<1x4x256xf32, #tpu.memory_space<vmem>>, vector<1x4x16xf32>
    %24 = vector.shape_cast %23 : vector<1x4x16xf32> to vector<4x16xf32>
    %c0_25 = arith.constant 0 : index
    %c145 = arith.constant 145 : index
    %25 = vector.load %arg5[%c0_25, %c145] : memref<8x342xf32, #tpu.memory_space<vmem>>, vector<4x16xf32>
    tpu.vector_store %arg5[%c0_25, %c145], %24 {strides = array<i32>} : memref<8x342xf32, #tpu.memory_space<vmem>>, vector<4x16xf32>,
    %c0_26 = arith.constant 0 : index
    %c0_27 = arith.constant 0 : index
    %c128 = arith.constant 128 : index
    %26 = vector.load %arg1[%c0_26, %c0_27, %c128] : memref<1x4x256xf32, #tpu.memory_space<vmem>>, vector<1x4x16xf32>
    %27 = vector.shape_cast %26 : vector<1x4x16xf32> to vector<4x16xf32>
    %c0_28 = arith.constant 0 : index
    %c163 = arith.constant 163 : index
    %28 = vector.load %arg5[%c0_28, %c163] : memref<8x342xf32, #tpu.memory_space<vmem>>, vector<4x16xf32>
    tpu.vector_store %arg5[%c0_28, %c163], %27 {strides = array<i32>} : memref<8x342xf32, #tpu.memory_space<vmem>>, vector<4x16xf32>,
    %c0_29 = arith.constant 0 : index
    %c0_30 = arith.constant 0 : index
    %c144 = arith.constant 144 : index
    %29 = vector.load %arg1[%c0_29, %c0_30, %c144] : memref<1x4x256xf32, #tpu.memory_space<vmem>>, vector<1x4x16xf32>
    %30 = vector.shape_cast %29 : vector<1x4x16xf32> to vector<4x16xf32>
    %c0_31 = arith.constant 0 : index
    %c181 = arith.constant 181 : index
    %31 = vector.load %arg5[%c0_31, %c181] : memref<8x342xf32, #tpu.memory_space<vmem>>, vector<4x16xf32>
    tpu.vector_store %arg5[%c0_31, %c181], %30 {strides = array<i32>} : memref<8x342xf32, #tpu.memory_space<vmem>>, vector<4x16xf32>,
    %c0_32 = arith.constant 0 : index
    %c0_33 = arith.constant 0 : index
    %c160 = arith.constant 160 : index
    %32 = vector.load %arg1[%c0_32, %c0_33, %c160] : memref<1x4x256xf32, #tpu.memory_space<vmem>>, vector<1x4x16xf32>
    %33 = vector.shape_cast %32 : vector<1x4x16xf32> to vector<4x16xf32>
    %c0_34 = arith.constant 0 : index
    %c199 = arith.constant 199 : index
    %34 = vector.load %arg5[%c0_34, %c199] : memref<8x342xf32, #tpu.memory_space<vmem>>, vector<4x16xf32>
    tpu.vector_store %arg5[%c0_34, %c199], %33 {strides = array<i32>} : memref<8x342xf32, #tpu.memory_space<vmem>>, vector<4x16xf32>,
    %c0_35 = arith.constant 0 : index
    %c0_36 = arith.constant 0 : index
    %c176 = arith.constant 176 : index
    %35 = vector.load %arg1[%c0_35, %c0_36, %c176] : memref<1x4x256xf32, #tpu.memory_space<vmem>>, vector<1x4x16xf32>
    %36 = vector.shape_cast %35 : vector<1x4x16xf32> to vector<4x16xf32>
    %c0_37 = arith.constant 0 : index
    %c217 = arith.constant 217 : index
    %37 = vector.load %arg5[%c0_37, %c217] : memref<8x342xf32, #tpu.memory_space<vmem>>, vector<4x16xf32>
    tpu.vector_store %arg5[%c0_37, %c217], %36 {strides = array<i32>} : memref<8x342xf32, #tpu.memory_space<vmem>>, vector<4x16xf32>,
    %c0_38 = arith.constant 0 : index
    %c0_39 = arith.constant 0 : index
    %c192 = arith.constant 192 : index
    %38 = vector.load %arg1[%c0_38, %c0_39, %c192] : memref<1x4x256xf32, #tpu.memory_space<vmem>>, vector<1x4x16xf32>
    %39 = vector.shape_cast %38 : vector<1x4x16xf32> to vector<4x16xf32>
    %c0_40 = arith.constant 0 : index
    %c235 = arith.constant 235 : index
    %40 = vector.load %arg5[%c0_40, %c235] : memref<8x342xf32, #tpu.memory_space<vmem>>, vector<4x16xf32>
    tpu.vector_store %arg5[%c0_40, %c235], %39 {strides = array<i32>} : memref<8x342xf32, #tpu.memory_space<vmem>>, vector<4x16xf32>,
    %c0_41 = arith.constant 0 : index
    %c0_42 = arith.constant 0 : index
    %c208 = arith.constant 208 : index
    %41 = vector.load %arg1[%c0_41, %c0_42, %c208] : memref<1x4x256xf32, #tpu.memory_space<vmem>>, vector<1x4x16xf32>
    %42 = vector.shape_cast %41 : vector<1x4x16xf32> to vector<4x16xf32>
    %c0_43 = arith.constant 0 : index
    %c253 = arith.constant 253 : index
    %43 = vector.load %arg5[%c0_43, %c253] : memref<8x342xf32, #tpu.memory_space<vmem>>, vector<4x16xf32>
    tpu.vector_store %arg5[%c0_43, %c253], %42 {strides = array<i32>} : memref<8x342xf32, #tpu.memory_space<vmem>>, vector<4x16xf32>,
    %c0_44 = arith.constant 0 : index
    %c0_45 = arith.constant 0 : index
    %c224 = arith.constant 224 : index
    %44 = vector.load %arg1[%c0_44, %c0_45, %c224] : memref<1x4x256xf32, #tpu.memory_space<vmem>>, vector<1x4x16xf32>
    %45 = vector.shape_cast %44 : vector<1x4x16xf32> to vector<4x16xf32>
    %c0_46 = arith.constant 0 : index
    %c271 = arith.constant 271 : index
    %46 = vector.load %arg5[%c0_46, %c271] : memref<8x342xf32, #tpu.memory_space<vmem>>, vector<4x16xf32>
    tpu.vector_store %arg5[%c0_46, %c271], %45 {strides = array<i32>} : memref<8x342xf32, #tpu.memory_space<vmem>>, vector<4x16xf32>,
    %c0_47 = arith.constant 0 : index
    %c0_48 = arith.constant 0 : index
    %c240 = arith.constant 240 : index
    %47 = vector.load %arg1[%c0_47, %c0_48, %c240] : memref<1x4x256xf32, #tpu.memory_space<vmem>>, vector<1x4x16xf32>
    %48 = vector.shape_cast %47 : vector<1x4x16xf32> to vector<4x16xf32>
    %c0_49 = arith.constant 0 : index
    %c289 = arith.constant 289 : index
    %49 = vector.load %arg5[%c0_49, %c289] : memref<8x342xf32, #tpu.memory_space<vmem>>, vector<4x16xf32>
    tpu.vector_store %arg5[%c0_49, %c289], %48 {strides = array<i32>} : memref<8x342xf32, #tpu.memory_space<vmem>>, vector<4x16xf32>,
    %c0_50 = arith.constant 0 : index
    %c0_51 = arith.constant 0 : index
    %50 = vector.load %arg5[%c0_50, %c0_51] : memref<8x342xf32, #tpu.memory_space<vmem>>, vector<8x288xf32>
    %c0_52 = arith.constant 0 : index
    %c0_53 = arith.constant 0 : index
    %51 = vector.load %arg6[%c0_52, %c0_53] : memref<72x288xf32, #tpu.memory_space<vmem>>, vector<8x288xf32>
    tpu.vector_store %arg6[%c0_52, %c0_53], %50 {strides = array<i32>} : memref<72x288xf32, #tpu.memory_space<vmem>>, vector<8x288xf32>,
    %c0_54 = arith.constant 0 : index
    %c1 = arith.constant 1 : index
    %52 = vector.load %arg5[%c0_54, %c1] : memref<8x342xf32, #tpu.memory_space<vmem>>, vector<8x288xf32>
    %c8 = arith.constant 8 : index
    %c0_55 = arith.constant 0 : index
    %53 = vector.load %arg6[%c8, %c0_55] : memref<72x288xf32, #tpu.memory_space<vmem>>, vector<8x288xf32>
    tpu.vector_store %arg6[%c8, %c0_55], %52 {strides = array<i32>} : memref<72x288xf32, #tpu.memory_space<vmem>>, vector<8x288xf32>,
    %c0_56 = arith.constant 0 : index
    %c2 = arith.constant 2 : index
    %54 = vector.load %arg5[%c0_56, %c2] : memref<8x342xf32, #tpu.memory_space<vmem>>, vector<8x288xf32>
    %c16_57 = arith.constant 16 : index
    %c0_58 = arith.constant 0 : index
    %55 = vector.load %arg6[%c16_57, %c0_58] : memref<72x288xf32, #tpu.memory_space<vmem>>, vector<8x288xf32>
    tpu.vector_store %arg6[%c16_57, %c0_58], %54 {strides = array<i32>} : memref<72x288xf32, #tpu.memory_space<vmem>>, vector<8x288xf32>,
    %c0_59 = arith.constant 0 : index
    %c18 = arith.constant 18 : index
    %56 = vector.load %arg5[%c0_59, %c18] : memref<8x342xf32, #tpu.memory_space<vmem>>, vector<8x288xf32>
    %c24 = arith.constant 24 : index
    %c0_60 = arith.constant 0 : index
    %57 = vector.load %arg6[%c24, %c0_60] : memref<72x288xf32, #tpu.memory_space<vmem>>, vector<8x288xf32>
    tpu.vector_store %arg6[%c24, %c0_60], %56 {strides = array<i32>} : memref<72x288xf32, #tpu.memory_space<vmem>>, vector<8x288xf32>,
    %c0_61 = arith.constant 0 : index
    %c19_62 = arith.constant 19 : index
    %58 = vector.load %arg5[%c0_61, %c19_62] : memref<8x342xf32, #tpu.memory_space<vmem>>, vector<8x288xf32>
    %c32_63 = arith.constant 32 : index
    %c0_64 = arith.constant 0 : index
    %59 = vector.load %arg6[%c32_63, %c0_64] : memref<72x288xf32, #tpu.memory_space<vmem>>, vector<8x288xf32>
    tpu.vector_store %arg6[%c32_63, %c0_64], %58 {strides = array<i32>} : memref<72x288xf32, #tpu.memory_space<vmem>>, vector<8x288xf32>,
    %c0_65 = arith.constant 0 : index
    %c20 = arith.constant 20 : index
    %60 = vector.load %arg5[%c0_65, %c20] : memref<8x342xf32, #tpu.memory_space<vmem>>, vector<8x288xf32>
    %c40 = arith.constant 40 : index
    %c0_66 = arith.constant 0 : index
    %61 = vector.load %arg6[%c40, %c0_66] : memref<72x288xf32, #tpu.memory_space<vmem>>, vector<8x288xf32>
    tpu.vector_store %arg6[%c40, %c0_66], %60 {strides = array<i32>} : memref<72x288xf32, #tpu.memory_space<vmem>>, vector<8x288xf32>,
    %c0_67 = arith.constant 0 : index
    %c36 = arith.constant 36 : index
    %62 = vector.load %arg5[%c0_67, %c36] : memref<8x342xf32, #tpu.memory_space<vmem>>, vector<8x288xf32>
    %c48_68 = arith.constant 48 : index
    %c0_69 = arith.constant 0 : index
    %63 = vector.load %arg6[%c48_68, %c0_69] : memref<72x288xf32, #tpu.memory_space<vmem>>, vector<8x288xf32>
    tpu.vector_store %arg6[%c48_68, %c0_69], %62 {strides = array<i32>} : memref<72x288xf32, #tpu.memory_space<vmem>>, vector<8x288xf32>,
    %c0_70 = arith.constant 0 : index
    %c37_71 = arith.constant 37 : index
    %64 = vector.load %arg5[%c0_70, %c37_71] : memref<8x342xf32, #tpu.memory_space<vmem>>, vector<8x288xf32>
    %c56 = arith.constant 56 : index
    %c0_72 = arith.constant 0 : index
    %65 = vector.load %arg6[%c56, %c0_72] : memref<72x288xf32, #tpu.memory_space<vmem>>, vector<8x288xf32>
    tpu.vector_store %arg6[%c56, %c0_72], %64 {strides = array<i32>} : memref<72x288xf32, #tpu.memory_space<vmem>>, vector<8x288xf32>,
    %c0_73 = arith.constant 0 : index
    %c38 = arith.constant 38 : index
    %66 = vector.load %arg5[%c0_73, %c38] : memref<8x342xf32, #tpu.memory_space<vmem>>, vector<8x288xf32>
    %c64_74 = arith.constant 64 : index
    %c0_75 = arith.constant 0 : index
    %67 = vector.load %arg6[%c64_74, %c0_75] : memref<72x288xf32, #tpu.memory_space<vmem>>, vector<8x288xf32>
    tpu.vector_store %arg6[%c64_74, %c0_75], %66 {strides = array<i32>} : memref<72x288xf32, #tpu.memory_space<vmem>>, vector<8x288xf32>,
    %c0_76 = arith.constant 0 : index
    %c0_77 = arith.constant 0 : index
    %68 = vector.load %arg2[%c0_76, %c0_77] : memref<8x72xf32, #tpu.memory_space<vmem>>, vector<8x72xf32>
    %c0_78 = arith.constant 0 : index
    %c0_79 = arith.constant 0 : index
    %69 = vector.load %arg6[%c0_78, %c0_79] : memref<72x288xf32, #tpu.memory_space<vmem>>, vector<72x288xf32>
    %cst_80 = arith.constant dense<0.000000e+00> : vector<8x288xf32>
    %70 = tpu.matmul %68, %69, %cst_80 {dimension_numbers = #tpu.dot_dimension_numbers<[1], [0], [0], [1], [0, 0, 1, 1], [], []>} : vector<8x72xf32>, vector<72x288xf32>, vector<8x288xf32> -> vector<8x288xf32>
    %c0_81 = arith.constant 0 : index
    %c0_82 = arith.constant 0 : index
    %71 = vector.load %arg3[%c0_81, %c0_82] : memref<8x1xf32, #tpu.memory_space<vmem>>, vector<8x1xf32>
    %72 = vector.broadcast %71 : vector<8x1xf32> to vector<8x288xf32>
    %73 = arith.addf %70, %72 : vector<8x288xf32>
    %cst_83 = arith.constant 0.000000e+00 : f32
    %74 = vector.broadcast %cst_83 : f32 to vector<8x288xf32>
    %75 = arith.maximumf %73, %74 : vector<8x288xf32>
    %76 = vector.extract_strided_slice %75 {offsets = [0, 0], sizes = [8, 16], strides = [1, 1]} : vector<8x288xf32> to vector<8x16xf32>
    %c0_84 = arith.constant 0 : index
    %c0_85 = arith.constant 0 : index
    %c0_86 = arith.constant 0 : index
    %77 = vector.load %arg4[%c0_84, %c0_85, %c0_86] : memref<1x8x256xf32, #tpu.memory_space<vmem>>, vector<1x8x16xf32>
    %78 = vector.shape_cast %77 : vector<1x8x16xf32> to vector<8x16xf32>
    %79 = vector.shape_cast %76 : vector<8x16xf32> to vector<1x8x16xf32>
    tpu.vector_store %arg4[%c0_84, %c0_85, %c0_86], %79 {strides = array<i32>} : memref<1x8x256xf32, #tpu.memory_space<vmem>>, vector<1x8x16xf32>,
    %80 = vector.extract_strided_slice %75 {offsets = [0, 18], sizes = [8, 16], strides = [1, 1]} : vector<8x288xf32> to vector<8x16xf32>
    %c0_87 = arith.constant 0 : index
    %c0_88 = arith.constant 0 : index
    %c16_89 = arith.constant 16 : index
    %81 = vector.load %arg4[%c0_87, %c0_88, %c16_89] : memref<1x8x256xf32, #tpu.memory_space<vmem>>, vector<1x8x16xf32>
    %82 = vector.shape_cast %81 : vector<1x8x16xf32> to vector<8x16xf32>
    %83 = vector.shape_cast %80 : vector<8x16xf32> to vector<1x8x16xf32>
    tpu.vector_store %arg4[%c0_87, %c0_88, %c16_89], %83 {strides = array<i32>} : memref<1x8x256xf32, #tpu.memory_space<vmem>>, vector<1x8x16xf32>,
    %84 = vector.extract_strided_slice %75 {offsets = [0, 36], sizes = [8, 16], strides = [1, 1]} : vector<8x288xf32> to vector<8x16xf32>
    %c0_90 = arith.constant 0 : index
    %c0_91 = arith.constant 0 : index
    %c32_92 = arith.constant 32 : index
    %85 = vector.load %arg4[%c0_90, %c0_91, %c32_92] : memref<1x8x256xf32, #tpu.memory_space<vmem>>, vector<1x8x16xf32>
    %86 = vector.shape_cast %85 : vector<1x8x16xf32> to vector<8x16xf32>
    %87 = vector.shape_cast %84 : vector<8x16xf32> to vector<1x8x16xf32>
    tpu.vector_store %arg4[%c0_90, %c0_91, %c32_92], %87 {strides = array<i32>} : memref<1x8x256xf32, #tpu.memory_space<vmem>>, vector<1x8x16xf32>,
    %88 = vector.extract_strided_slice %75 {offsets = [0, 54], sizes = [8, 16], strides = [1, 1]} : vector<8x288xf32> to vector<8x16xf32>
    %c0_93 = arith.constant 0 : index
    %c0_94 = arith.constant 0 : index
    %c48_95 = arith.constant 48 : index
    %89 = vector.load %arg4[%c0_93, %c0_94, %c48_95] : memref<1x8x256xf32, #tpu.memory_space<vmem>>, vector<1x8x16xf32>
    %90 = vector.shape_cast %89 : vector<1x8x16xf32> to vector<8x16xf32>
    %91 = vector.shape_cast %88 : vector<8x16xf32> to vector<1x8x16xf32>
    tpu.vector_store %arg4[%c0_93, %c0_94, %c48_95], %91 {strides = array<i32>} : memref<1x8x256xf32, #tpu.memory_space<vmem>>, vector<1x8x16xf32>,
    %92 = vector.extract_strided_slice %75 {offsets = [0, 72], sizes = [8, 16], strides = [1, 1]} : vector<8x288xf32> to vector<8x16xf32>
    %c0_96 = arith.constant 0 : index
    %c0_97 = arith.constant 0 : index
    %c64_98 = arith.constant 64 : index
    %93 = vector.load %arg4[%c0_96, %c0_97, %c64_98] : memref<1x8x256xf32, #tpu.memory_space<vmem>>, vector<1x8x16xf32>
    %94 = vector.shape_cast %93 : vector<1x8x16xf32> to vector<8x16xf32>
    %95 = vector.shape_cast %92 : vector<8x16xf32> to vector<1x8x16xf32>
    tpu.vector_store %arg4[%c0_96, %c0_97, %c64_98], %95 {strides = array<i32>} : memref<1x8x256xf32, #tpu.memory_space<vmem>>, vector<1x8x16xf32>,
    %96 = vector.extract_strided_slice %75 {offsets = [0, 90], sizes = [8, 16], strides = [1, 1]} : vector<8x288xf32> to vector<8x16xf32>
    %c0_99 = arith.constant 0 : index
    %c0_100 = arith.constant 0 : index
    %c80_101 = arith.constant 80 : index
    %97 = vector.load %arg4[%c0_99, %c0_100, %c80_101] : memref<1x8x256xf32, #tpu.memory_space<vmem>>, vector<1x8x16xf32>
    %98 = vector.shape_cast %97 : vector<1x8x16xf32> to vector<8x16xf32>
    %99 = vector.shape_cast %96 : vector<8x16xf32> to vector<1x8x16xf32>
    tpu.vector_store %arg4[%c0_99, %c0_100, %c80_101], %99 {strides = array<i32>} : memref<1x8x256xf32, #tpu.memory_space<vmem>>, vector<1x8x16xf32>,
    %100 = vector.extract_strided_slice %75 {offsets = [0, 108], sizes = [8, 16], strides = [1, 1]} : vector<8x288xf32> to vector<8x16xf32>
    %c0_102 = arith.constant 0 : index
    %c0_103 = arith.constant 0 : index
    %c96_104 = arith.constant 96 : index
    %101 = vector.load %arg4[%c0_102, %c0_103, %c96_104] : memref<1x8x256xf32, #tpu.memory_space<vmem>>, vector<1x8x16xf32>
    %102 = vector.shape_cast %101 : vector<1x8x16xf32> to vector<8x16xf32>
    %103 = vector.shape_cast %100 : vector<8x16xf32> to vector<1x8x16xf32>
    tpu.vector_store %arg4[%c0_102, %c0_103, %c96_104], %103 {strides = array<i32>} : memref<1x8x256xf32, #tpu.memory_space<vmem>>, vector<1x8x16xf32>,
    %104 = vector.extract_strided_slice %75 {offsets = [0, 126], sizes = [8, 16], strides = [1, 1]} : vector<8x288xf32> to vector<8x16xf32>
    %c0_105 = arith.constant 0 : index
    %c0_106 = arith.constant 0 : index
    %c112_107 = arith.constant 112 : index
    %105 = vector.load %arg4[%c0_105, %c0_106, %c112_107] : memref<1x8x256xf32, #tpu.memory_space<vmem>>, vector<1x8x16xf32>
    %106 = vector.shape_cast %105 : vector<1x8x16xf32> to vector<8x16xf32>
    %107 = vector.shape_cast %104 : vector<8x16xf32> to vector<1x8x16xf32>
    tpu.vector_store %arg4[%c0_105, %c0_106, %c112_107], %107 {strides = array<i32>} : memref<1x8x256xf32, #tpu.memory_space<vmem>>, vector<1x8x16xf32>,
    %108 = vector.extract_strided_slice %75 {offsets = [0, 144], sizes = [8, 16], strides = [1, 1]} : vector<8x288xf32> to vector<8x16xf32>
    %c0_108 = arith.constant 0 : index
    %c0_109 = arith.constant 0 : index
    %c128_110 = arith.constant 128 : index
    %109 = vector.load %arg4[%c0_108, %c0_109, %c128_110] : memref<1x8x256xf32, #tpu.memory_space<vmem>>, vector<1x8x16xf32>
    %110 = vector.shape_cast %109 : vector<1x8x16xf32> to vector<8x16xf32>
    %111 = vector.shape_cast %108 : vector<8x16xf32> to vector<1x8x16xf32>
    tpu.vector_store %arg4[%c0_108, %c0_109, %c128_110], %111 {strides = array<i32>} : memref<1x8x256xf32, #tpu.memory_space<vmem>>, vector<1x8x16xf32>,
    %112 = vector.extract_strided_slice %75 {offsets = [0, 162], sizes = [8, 16], strides = [1, 1]} : vector<8x288xf32> to vector<8x16xf32>
    %c0_111 = arith.constant 0 : index
    %c0_112 = arith.constant 0 : index
    %c144_113 = arith.constant 144 : index
    %113 = vector.load %arg4[%c0_111, %c0_112, %c144_113] : memref<1x8x256xf32, #tpu.memory_space<vmem>>, vector<1x8x16xf32>
    %114 = vector.shape_cast %113 : vector<1x8x16xf32> to vector<8x16xf32>
    %115 = vector.shape_cast %112 : vector<8x16xf32> to vector<1x8x16xf32>
    tpu.vector_store %arg4[%c0_111, %c0_112, %c144_113], %115 {strides = array<i32>} : memref<1x8x256xf32, #tpu.memory_space<vmem>>, vector<1x8x16xf32>,
    %116 = vector.extract_strided_slice %75 {offsets = [0, 180], sizes = [8, 16], strides = [1, 1]} : vector<8x288xf32> to vector<8x16xf32>
    %c0_114 = arith.constant 0 : index
    %c0_115 = arith.constant 0 : index
    %c160_116 = arith.constant 160 : index
    %117 = vector.load %arg4[%c0_114, %c0_115, %c160_116] : memref<1x8x256xf32, #tpu.memory_space<vmem>>, vector<1x8x16xf32>
    %118 = vector.shape_cast %117 : vector<1x8x16xf32> to vector<8x16xf32>
    %119 = vector.shape_cast %116 : vector<8x16xf32> to vector<1x8x16xf32>
    tpu.vector_store %arg4[%c0_114, %c0_115, %c160_116], %119 {strides = array<i32>} : memref<1x8x256xf32, #tpu.memory_space<vmem>>, vector<1x8x16xf32>,
    %120 = vector.extract_strided_slice %75 {offsets = [0, 198], sizes = [8, 16], strides = [1, 1]} : vector<8x288xf32> to vector<8x16xf32>
    %c0_117 = arith.constant 0 : index
    %c0_118 = arith.constant 0 : index
    %c176_119 = arith.constant 176 : index
    %121 = vector.load %arg4[%c0_117, %c0_118, %c176_119] : memref<1x8x256xf32, #tpu.memory_space<vmem>>, vector<1x8x16xf32>
    %122 = vector.shape_cast %121 : vector<1x8x16xf32> to vector<8x16xf32>
    %123 = vector.shape_cast %120 : vector<8x16xf32> to vector<1x8x16xf32>
    tpu.vector_store %arg4[%c0_117, %c0_118, %c176_119], %123 {strides = array<i32>} : memref<1x8x256xf32, #tpu.memory_space<vmem>>, vector<1x8x16xf32>,
    %124 = vector.extract_strided_slice %75 {offsets = [0, 216], sizes = [8, 16], strides = [1, 1]} : vector<8x288xf32> to vector<8x16xf32>
    %c0_120 = arith.constant 0 : index
    %c0_121 = arith.constant 0 : index
    %c192_122 = arith.constant 192 : index
    %125 = vector.load %arg4[%c0_120, %c0_121, %c192_122] : memref<1x8x256xf32, #tpu.memory_space<vmem>>, vector<1x8x16xf32>
    %126 = vector.shape_cast %125 : vector<1x8x16xf32> to vector<8x16xf32>
    %127 = vector.shape_cast %124 : vector<8x16xf32> to vector<1x8x16xf32>
    tpu.vector_store %arg4[%c0_120, %c0_121, %c192_122], %127 {strides = array<i32>} : memref<1x8x256xf32, #tpu.memory_space<vmem>>, vector<1x8x16xf32>,
    %128 = vector.extract_strided_slice %75 {offsets = [0, 234], sizes = [8, 16], strides = [1, 1]} : vector<8x288xf32> to vector<8x16xf32>
    %c0_123 = arith.constant 0 : index
    %c0_124 = arith.constant 0 : index
    %c208_125 = arith.constant 208 : index
    %129 = vector.load %arg4[%c0_123, %c0_124, %c208_125] : memref<1x8x256xf32, #tpu.memory_space<vmem>>, vector<1x8x16xf32>
    %130 = vector.shape_cast %129 : vector<1x8x16xf32> to vector<8x16xf32>
    %131 = vector.shape_cast %128 : vector<8x16xf32> to vector<1x8x16xf32>
    tpu.vector_store %arg4[%c0_123, %c0_124, %c208_125], %131 {strides = array<i32>} : memref<1x8x256xf32, #tpu.memory_space<vmem>>, vector<1x8x16xf32>,
    %132 = vector.extract_strided_slice %75 {offsets = [0, 252], sizes = [8, 16], strides = [1, 1]} : vector<8x288xf32> to vector<8x16xf32>
    %c0_126 = arith.constant 0 : index
    %c0_127 = arith.constant 0 : index
    %c224_128 = arith.constant 224 : index
    %133 = vector.load %arg4[%c0_126, %c0_127, %c224_128] : memref<1x8x256xf32, #tpu.memory_space<vmem>>, vector<1x8x16xf32>
    %134 = vector.shape_cast %133 : vector<1x8x16xf32> to vector<8x16xf32>
    %135 = vector.shape_cast %132 : vector<8x16xf32> to vector<1x8x16xf32>
    tpu.vector_store %arg4[%c0_126, %c0_127, %c224_128], %135 {strides = array<i32>} : memref<1x8x256xf32, #tpu.memory_space<vmem>>, vector<1x8x16xf32>,
    %136 = vector.extract_strided_slice %75 {offsets = [0, 270], sizes = [8, 16], strides = [1, 1]} : vector<8x288xf32> to vector<8x16xf32>
    %c0_129 = arith.constant 0 : index
    %c0_130 = arith.constant 0 : index
    %c240_131 = arith.constant 240 : index
    %137 = vector.load %arg4[%c0_129, %c0_130, %c240_131] : memref<1x8x256xf32, #tpu.memory_space<vmem>>, vector<1x8x16xf32>
    %138 = vector.shape_cast %137 : vector<1x8x16xf32> to vector<8x16xf32>
    %139 = vector.shape_cast %136 : vector<8x16xf32> to vector<1x8x16xf32>
    tpu.vector_store %arg4[%c0_129, %c0_130, %c240_131], %139 {strides = array<i32>} : memref<1x8x256xf32, #tpu.memory_space<vmem>>, vector<1x8x16xf32>,
    return
  }
  func.func @transform_0(%arg0: i32) -> (i32, i32, i32) {
    %c0_i32 = arith.constant 0 : i32
    %c0_i32_0 = arith.constant 0 : i32
    %c0_i32_1 = arith.constant 0 : i32
    return %arg0, %c0_i32, %c0_i32_0 : i32, i32, i32
  }
  func.func @transform_1(%arg0: i32) -> (i32, i32) {
    %c0_i32 = arith.constant 0 : i32
    %c0_i32_0 = arith.constant 0 : i32
    %c0_i32_1 = arith.constant 0 : i32
    return %c0_i32, %c0_i32_0 : i32, i32
  }
  func.func @transform_2(%arg0: i32) -> (i32, i32) {
    %c0_i32 = arith.constant 0 : i32
    %c0_i32_0 = arith.constant 0 : i32
    %c0_i32_1 = arith.constant 0 : i32
    return %c0_i32, %c0_i32_0 : i32, i32
  }
  func.func @transform_3(%arg0: i32) -> (i32, i32, i32) {
    %c0_i32 = arith.constant 0 : i32
    %c0_i32_0 = arith.constant 0 : i32
    %c0_i32_1 = arith.constant 0 : i32
    return %arg0, %c0_i32, %c0_i32_0 : i32, i32, i32
  }
}

</mosaic_0001>

<bundles_post_ra>
// kernel: tpu_custom_call.1
= control target key start
LH: loop header
LB: loop body
LE: loop exit
PB: predicated region body
PF: predicated region fallthrough
CT: control target
= control target key end

     0   :  { %8 = vsyncpa [#allocation5], 0  ;;  %s1425_s0 = inlined_call_operand.hbm [shape: f32[2,4,256], index: 0, kind: input, shape index: {}]   ;;  %s1426_s1 = inlined_call_operand.vmem [shape: f32[8,72], index: 1, kind: input, shape index: {}]   ;;  %s1427_s2 = inlined_call_operand.vmem [shape: f32[8,1], index: 2, kind: input, shape index: {}]   ;;  %s1428_s3 = inlined_call_operand.hbm [shape: f32[2,8,256], index: 3, kind: output, shape index: {}]  }
   0x1   :  { %10 = vsyncpa [#allocation5 + $0x1], 0 }
   0x2   :  { %11 = vsyncpa [#allocation6], 0 }
   0x3   :  { %13 = vsyncpa [#allocation6 + $0x1], 0  ;;  %s1153_s12 = smov 0   ;;  %s1155_s13 = smov 0  }
   0x4   :  { %s1157_s14 = smov 0   ;;  %s1159_s15 = smov 0  }
   0x5 LB: > { %s1174_s16 = sadd.s32 4294967295, %s1089_s15   ;;  %s829_s17 = sadd.s32 4294967294, %s1089_s15   ;;  %s1089_s15 = sphi %s1159_s15, %s1443_s15   ;;  %s1085_s14 = sphi %s1157_s14, %s1442_s14   ;;  %s1081_s13 = sphi %s1155_s13, %s1441_s13   ;;  %s1077_s12 = sphi %s1153_s12, %s1440_s12  }
   0x6   : > { %s1178_s18 = sadd.s32 1, %s1089_s15   ;;  %s26_s19 = sadd.s32 1, %s1085_s14 }
   0x7   : > { %s23_s20 = ssub.s32 %s1089_s15, %s1178_s18  ;;  %p33_p0 = scmp.ne.s32.totalorder %s1085_s14, %s1081_s13 }
   0x8   : > { %p24_p1 = scmp.eq.s32.totalorder %s23_s20, 0  ;;  %p34_p2 = scmp.eq.s32.totalorder %s1089_s15, 0 }
   0x9   : > { %p39_p3 = scmp.ne.s32.totalorder %s1081_s13, %s1077_s12  ;;  %p40_p4 = scmp.eq.s32.totalorder %s1174_s16, 0 }
   0xa   : > { %s1190_s21 = scalar_select %p24_p1, %s1085_s14, %s26_s19  }
   0xb   : > { %p1192_p5 = por %p34_p2, %p33_p0  ;;  %p1196_p6 = por %p40_p4, %p39_p3 }
   0xc   : > { %p105_p7 = scmp.eq.s32.totalorder %s1174_s16, 1  ;;  %p111_p8 = scmp.eq.s32.totalorder %s829_s17, 1 }
   0xd   : > { %p918_p10 = scmp.lt.s32.totalorder %s1089_s15, 2  ;;  %s137_s26 = sand.u32 1, %s1085_s14  }
   0xe   : > { %p1203_p11 = por %p105_p7, %p33_p0  ;;  %p1207_p12 = por %p111_p8, %p39_p3 }
   0xf   : > { %s845_s27 = sshll.u32 %s1089_s15, 7  ;;  %s832_s28 = sshll.u32 %s137_s26, 3 }
  0x10   : > { %s1432_s24 = scalar_select %p1203_p11, 1, 0 }
  0x11   : > { %s1433_s25 = scalar_select %p1207_p12, 1, 0 }
  0x12   : > { %s1216_s4 = scalar_lea.hbm %s1425_s0, %s845_s27  ;;  %s141_s5 = scalar_lea.vmem [#allocation4], %s832_s28 }
  0x13   : > { %s149_s6 = sshll.u32 %s141_s5, 4  ;;  %p1220_p13 = pnand %p918_p10, %p1192_p5  ;;  %s1224_s6 = int_to_ptr.vmem [resolvable:$true] %s149_s6 }
  0x14   : > { %s138_s8 = scalar_lea.sflag [#allocation5], %s137_s26  ;;  %s993_s9 = scalar_lea.hbm %s1216_s4, 128 }
  0x15   : > { %p994_p2 = scmp.ne.s32.totalorder %s1216_s4, %s993_s9  ;;  %p995_p3 = pneg %p1220_p13 }
  0x16   : > { %s998_s17 = scalar_lea.hbm %s1425_s0, 256  ;;  %p999_p5 = scmp.lt.u32.totalorder %s1216_s4, %s1425_s0 }
  0x17   : > { %p996_p4 = pnand %p995_p3, %p994_p2  ;;  %p1000_p8 = scmp.lt.u32.totalorder %s998_s17, %s993_s9 }
  0x18   : > { %p1002_p9 = scmp.lt.u32.totalorder %s993_s9, %s1216_s4 }
  0x19   : > { %p997_p7 = pneg %p996_p4  ;;  %p1001_p10 = por %p1000_p8, %p999_p5 }
  0x1b   : > { %p1003_p0 = por %p1002_p9, %p1001_p10 }
  0x1d   : > { %p1004_p1 = pnand %p1003_p0, %p997_p7 }
  0x1f   : > { %1007 = shalt.err (!%p1004_p1)
}
  0x20   : > { %s1008_s22 = scalar_lea.vmem %s1224_s6, 128  ;;  %s1091_s26 = smov [#allocation4]  }
  0x21   : > { %p1009_p2 = scmp.ne.s32.totalorder %s1224_s6, %s1008_s22  ;;  %s1013_s27 = sshll.u32 %s1091_s26, 4  ;;  %s1014_s27 = int_to_ptr.vmem [resolvable:$false] %s1013_s27 }
  0x22   : > { %s1015_s28 = scalar_lea.vmem %s1014_s27, 256  ;;  %p1016_p11 = scmp.lt.s32.totalorder %s1224_s6, %s1014_s27 }
  0x23   : > { %p1011_p4 = pnand %p1009_p2, %p995_p3  ;;  %p1017_p5 = scmp.lt.s32.totalorder %s1015_s28, %s1008_s22 }
  0x25   : > { %p1012_p12 = pneg %p1011_p4  ;;  %p1018_p8 = por %p1017_p5, %p1016_p11 }
  0x27   : > { %p1019_p9 = pnand %p1018_p8, %p1012_p12 }
  0x29   : > { %1022 = shalt.err (!%p1019_p9)
}
  0x2a   : > { %913 = dma.hbm_to_vmem [thread:$0]  (!%p1220_p13), %s1216_s4, 128, %s1224_s6, %s138_s8  }
  0x2b   : > { %p1435_p0 = scmp.lt.s32.totalorder %s1089_s15, 3  ;;  %p1436_p1 = scmp.ge.s32.totalorder %s1089_s15, 1 }
  0x2d   : > { %p155_p3 = pnand %p1436_p1, %p1435_p0 }
  0x2e   : > { %s1258_s29 = sand.u32 (!%p155_p3), 1, %s1081_s13  }
  0x2f   : > { %158 = sbr.rel (%p155_p3) target bundleno = 749 (0x2ed), region = 32  ;;  %s836_s30 = sshll.u32 (!%p155_p3), %s1258_s29, 3 }
  0x30   : > { %s161_s5 = scalar_lea.sflag (!%p155_p3), [#allocation5], %s1258_s29  ;;  %s1262_s9 = scalar_lea.vmem (!%p155_p3), [#allocation4], %s836_s30 }
  0x36   : > { %1068 = dma.done.wait (%p1196_p6), %s161_s5, 128  }
  0x37   : > { %1070 = vsyncadd (%p1196_p6), %s161_s5, 4294967168  ;;  %v1092_v0 = vmov 0.0   ;;  %v233_v1 = vld [vmem:[%s1262_s9] sm:$0xf]  ;;  %s1093_s4 = smov 31   ;;  %s1094_s6 = smov 19  }
  0x38   : > { %188 = vst [vmem:[#allocation2 + $0x8] sm:$0xff] %v1092_v0  ;;  %187 = vst [vmem:[#allocation2] sm:$0xff] %v1092_v0  ;;  %584 = vmatprep.mubr.f32.mxu0 %v1092_v0  ;;  %v191_v2 = vld [vmem:[%s1262_s9] sm:$0xf]  ;;  %235 = vrot.lane.b32.xlu0 %v233_v1, %s1093_s4  ;;  %v249_v4 = vld [vmem:[%s1262_s9 + $0x4] sm:$0xf] }
  0x39   : > { %193 = vrot.lane.b32.xlu1 %v191_v2, %s1094_s6  ;;  %v242_v3 = vld [vmem:[%s1262_s9] sm:$0xf]  ;;  %s1095_s23 = smov 33   ;;  %s1096_s7 = smov 35   ;;  %v256_v6 = vld [vmem:[%s1262_s9 + $0x4] sm:$0xf] }
  0x3a   : > { %v198_v5 = vld [vmem:[%s1262_s9] sm:$0xf]  ;;  %vm189_vm0 = vcmask 703488   ;;  %s1097_s8 = smov 21   ;;  %s1098_s10 = smov 37   ;;  %vm240_vm1 = vcmask 117760  }
  0x3b   : > { %190 = vst.msk [vmem:[#allocation2 + $0x10] sm:$0xff] %vm189_vm0, %v1092_v0  ;;  %v205_v7 = vld [vmem:[%s1262_s9] sm:$0xf]  ;;  %v263_v8 = vld [vmem:[%s1262_s9 + $0x4] sm:$0xf]  ;;  %s1099_s11 = smov 23  }
  0x3c   : > { %244 = vrot.lane.b32.xlu0 %v242_v3, %s1095_s23  ;;  %s1100_s17 = smov 39   ;;  %v212_v9 = vld [vmem:[%s1262_s9] sm:$0xf]  ;;  %v270_v10 = vld [vmem:[%s1262_s9 + $0x4] sm:$0xf]  ;;  %s1101_s19 = smov 25  }
  0x3d   : > { %251 = vrot.lane.b32.xlu1 %v249_v4, %s1096_s7  ;;  %s1102_s20 = smov 41   ;;  %v284_v11 = vld [vmem:[%s1262_s9 + $0x4] sm:$0xf]  ;;  %v219_v12 = vld [vmem:[%s1262_s9] sm:$0xf]  ;;  %s1103_s22 = smov 45  }
  0x3e   : > { %s1104_s26 = smov 27   ;;  %v277_v13 = vld [vmem:[%s1262_s9 + $0x4] sm:$0xf]  ;;  %s1105_s27 = smov 43   ;;  %v226_v15 = vld [vmem:[%s1262_s9] sm:$0xf] }
  0x3f   : > { %v293_v14 = vld [vmem:[%s1262_s9 + $0x4] sm:$0xf]  ;;  %s1106_s28 = smov 47   ;;  %s1107_s30 = smov 29   ;;  %vm196_vm2 = vcmask 281752   ;;  %vm247_vm3 = vcmask 265352  }
  0x40   : > { %200 = vrot.lane.b32.xlu0 %v198_v5, %s1097_s8  ;;  %v300_v16 = vld [vmem:[%s1262_s9 + $0x4] sm:$0xf]  ;;  %s1108_s5 = smov 49   ;;  %vm254_vm4 = vcmask 412952   ;;  %vm203_vm5 = vcmask 429352   ;;  %vm261_vm6 = vcmask 560552  }
  0x41   : > { %258 = vrot.lane.b32.xlu1 %v256_v6, %s1098_s10  ;;  %vm210_vm7 = vcmask 576952   ;;  %vm268_vm8 = vcmask 708152   ;;  %vm217_vm9 = vcmask 724552   ;;  %vm275_vm10 = vcmask 855752   ;;  %s1110_s9 = smov 126   ;;  %s1111_s4 = smov 127  }
  0x42   : > { %vm291_vm11 = vcmask 101376   ;;  %vm224_vm12 = vcmask 872152   ;;  %vm282_vm13 = vcmask 1003352   ;;  %vm298_vm14 = vcmask 248952   ;;  %s1112_s6 = smov 110   ;;  %s1113_s23 = smov 109  }
  0x43   : > { %vm289_vm15 = vcmask 1044456   ;;  %vm231_vm0 = vcmask 1019752   ;;  %v1109_v34 = vmov 0.0|0.0   ;;  %s1114_s7 = smov 108   ;;  %s1115_s8 = smov 92   ;;  %v1119_v37 = vmov 0  }
  0x44   : > { %207 = vrot.lane.b32.xlu0 %v205_v7, %s1099_s11  ;;  %894 = vmatprep.subr.bf16.mxu1 %v1109_v34  ;;  %s1116_s10 = smov 91   ;;  %s1118_s11 = smov 90   ;;  %v510_v38 = vld [vmem:[%s1427_s2] sm:$0xff] }
  0x45   : > { %265 = vrot.lane.b32.xlu1 %v263_v8, %s1100_s17  ;;  %992 = vset.pattern.permute.xlu0 %v1119_v37  ;;  %s1129_s17 = smov 104   ;;  %p1437_p11 = scmp.ne.s32.totalorder %s1432_s24, 0 }
  0x48   : > { %214 = vrot.lane.b32.xlu0 %v212_v9, %s1101_s19  ;;  %s1130_s19 = smov 102  }
  0x49   : > { %272 = vrot.lane.b32.xlu1 %v270_v10, %s1102_s20 }
  0x4c   : > { %286 = vrot.lane.b32.xlu0 %v284_v11, %s1103_s22 }
  0x4d   : > { %221 = vrot.lane.b32.xlu1 %v219_v12, %s1104_s26  ;;  %s837_s26 = sshll.u32 %s1258_s29, 4 }
  0x50   : > { %279 = vrot.lane.b32.xlu0 %v277_v13, %s1105_s27  ;;  %s1342_s27 = scalar_lea.vmem [#allocation7], %s837_s26 }
  0x51   : > { %295 = vrot.lane.b32.xlu1 %v293_v14, %s1106_s28  ;;  %s1120_s28 = smov 124   ;;  %s759_s20 = sshll.u32 %s1342_s27, 4  ;;  %s1381_s20 = int_to_ptr.vmem [resolvable:$true] %s759_s20 }
  0x54   : > { %228 = vrot.lane.b32.xlu0 %v226_v15, %s1107_s30  ;;  %s1121_s30 = smov 100  }
  0x55   : > { %302 = vrot.lane.b32.xlu1 %v300_v16, %s1108_s5  ;;  %s1122_s5 = smov 122  }
  0xaa   : > { %v236_v17 = vpop.permute.xlu0 %235 }
  0xab   : > { %v194_v18 = vpop.permute.xlu1 %193  ;;  %241 = vst.msk [vmem:[#allocation2 + $0x8] sm:$0xf] %vm240_vm1, %v236_v17  ;;  %vm305_vm1 = vcmask 396552  }
  0xac   : > { %197 = vst.msk [vmem:[#allocation2] sm:$0xf] %vm196_vm2, %v194_v18  ;;  %vm238_vm2 = vcmask 1044472  }
  0xae   : > { %v245_v19 = vpop.permute.xlu0 %244 }
  0xaf   : > { %v252_v20 = vpop.permute.xlu1 %251  ;;  %248 = vst.msk [vmem:[#allocation2 + $0x8] sm:$0xf] %vm247_vm3, %v245_v19  ;;  %vm312_vm3 = vcmask 261120  }
  0xb0   : > { %255 = vst.msk [vmem:[#allocation2 + $0x8] sm:$0xf] %vm254_vm4, %v252_v20  ;;  %vm1117_vm4 = vmmov 0  }
  0xb1   : > { %875 = vmatprep.mubr.msk.f32.mxu1 %vm1117_vm4, %v1092_v0  ;;  %vm695_vm4 = vcmask 917248  }
  0xb2   : > { %v201_v21 = vpop.permute.xlu0 %200 }
  0xb3   : > { %v259_v22 = vpop.permute.xlu1 %258  ;;  %204 = vst.msk [vmem:[#allocation2] sm:$0xf] %vm203_vm5, %v201_v21  ;;  %vm347_vm5 = vcmask 1031168  }
  0xb4   : > { %262 = vst.msk [vmem:[#allocation2 + $0x8] sm:$0xf] %vm261_vm6, %v259_v22  ;;  %vm368_vm6 = vcmask 900096  }
  0xb6   : > { %v208_v23 = vpop.permute.xlu0 %207 }
  0xb7   : > { %v266_v24 = vpop.permute.xlu1 %265  ;;  %211 = vst.msk [vmem:[#allocation2] sm:$0xf] %vm210_vm7, %v208_v23  ;;  %vm389_vm7 = vcmask 891904  }
  0xb8   : > { %269 = vst.msk [vmem:[#allocation2 + $0x8] sm:$0xf] %vm268_vm8, %v266_v24  ;;  %vm326_vm8 = vcmask 1039360  }
  0xba   : > { %v215_v25 = vpop.permute.xlu0 %214 }
  0xbb   : > { %v273_v26 = vpop.permute.xlu1 %272  ;;  %218 = vst.msk [vmem:[#allocation2] sm:$0xf] %vm217_vm9, %v215_v25  ;;  %vm410_vm9 = vcmask 883712  }
  0xbc   : > { %276 = vst.msk [vmem:[#allocation2 + $0x8] sm:$0xf] %vm275_vm10, %v273_v26  ;;  %vm431_vm10 = vcmask 752640  }
  0xbe   : > { %v287_v27 = vpop.permute.xlu0 %286 }
  0xbf   : > { %v222_v28 = vpop.permute.xlu1 %221  ;;  %292 = vst.msk [vmem:[#allocation2 + $0x10] sm:$0xf] %vm291_vm11, %v287_v27  ;;  %vm452_vm11 = vcmask 744448  }
  0xc0   : > { %225 = vst.msk [vmem:[#allocation2] sm:$0xf] %vm224_vm12, %v222_v28  ;;  %vm473_vm12 = vcmask 736256  }
  0xc2   : > { %v280_v29 = vpop.permute.xlu0 %279 }
  0xc3   : > { %v296_v30 = vpop.permute.xlu1 %295  ;;  %283 = vst.msk [vmem:[#allocation2 + $0x8] sm:$0xf] %vm282_vm13, %v280_v29  ;;  %vm516_vm13 = vcmask 588800  }
  0xc4   : > { %299 = vst.msk [vmem:[#allocation2 + $0x10] sm:$0xf] %vm298_vm14, %v296_v30  ;;  %vm664_vm14 = vcmask 130048  }
  0xc5   : > { %290 = vst.msk [vmem:[#allocation2 + $0x8] sm:$0xf] %vm289_vm15, %v287_v27  ;;  %vm670_vm15 = vcmask 261248  }
  0xc6   : > { %v229_v31 = vpop.permute.xlu0 %228 }
  0xc7   : > { %v303_v32 = vpop.permute.xlu1 %302  ;;  %232 = vst.msk [vmem:[#allocation2] sm:$0xf] %vm231_vm0, %v229_v31  ;;  %vm675_vm0 = vcmask 392448  }
  0xc8   : > { %306 = vst.msk [vmem:[#allocation2 + $0x10] sm:$0xf] %vm305_vm1, %v303_v32  ;;  %vm680_vm1 = vcmask 523648  }
  0xc9   : > { %239 = vst.msk [vmem:[#allocation2] sm:$0xf] %vm238_vm2, %v236_v17  ;;  %vm685_vm2 = vcmask 654848  }
  0xcc   : > { %v1288_v33 = vld [vmem:[#allocation2 + $0x8] sm:$0xff] }
  0xcf   : > { %v309_v35 = vld [vmem:[#allocation2 + $0x10] sm:$0xff] }
  0xd0   : > { %345 = vrot.lane.b32.xlu0 %v309_v35, %s1110_s9  ;;  %324 = vrot.lane.b32.xlu1 %v309_v35, %s1111_s4  ;;  %v1292_v36 = vld [vmem:[#allocation2] sm:$0xff]  ;;  %313 = vst.msk [vmem:[#allocation3 + $0x10] sm:$0xff] %vm312_vm3, %v309_v35 }
  0xd4   : > { %366 = vrot.lane.b32.xlu0 %v309_v35, %s1112_s6  ;;  %341 = vrot.lane.b32.xlu1 %v1292_v36, %s1110_s9 }
  0xd7   : > { %v485_v45 = vld [vmem:[#allocation3 + $0x10] sm:$0xff] }
  0xd8   : > { %387 = vrot.lane.b32.xlu0 %v309_v35, %s1113_s23  ;;  %383 = vrot.lane.b32.xlu1 %v1292_v36, %s1113_s23 }
  0xdc   : > { %408 = vrot.lane.b32.xlu0 %v309_v35, %s1114_s7  ;;  %425 = vrot.lane.b32.xlu1 %v1292_v36, %s1115_s8 }
  0xe0   : > { %343 = vrot.lane.b32.xlu1 %v1288_v33, %s1110_s9  ;;  %320 = vrot.lane.b32.xlu0 %v1292_v36, %s1111_s4 }
  0xe4   : > { %364 = vrot.lane.b32.xlu1 %v1288_v33, %s1112_s6  ;;  %362 = vrot.lane.b32.xlu0 %v1292_v36, %s1112_s6 }
  0xe8   : > { %385 = vrot.lane.b32.xlu1 %v1288_v33, %s1113_s23  ;;  %322 = vrot.lane.b32.xlu0 %v1288_v33, %s1111_s4  ;;  %s1123_s4 = smov 114   ;;  %s1124_s23 = smov 120  }
  0xec   : > { %406 = vrot.lane.b32.xlu1 %v1288_v33, %s1114_s7  ;;  %404 = vrot.lane.b32.xlu0 %v1292_v36, %s1114_s7 }
  0xf0   : > { %427 = vrot.lane.b32.xlu1 %v1288_v33, %s1115_s8  ;;  %429 = vrot.lane.b32.xlu0 %v309_v35, %s1115_s8  ;;  %s1126_s8 = smov 116  }
  0xf4   : > { %448 = vrot.lane.b32.xlu1 %v1288_v33, %s1116_s10  ;;  %450 = vrot.lane.b32.xlu0 %v309_v35, %s1116_s10 }
  0xf8   : > { %469 = vrot.lane.b32.xlu1 %v1288_v33, %s1118_s11  ;;  %446 = vrot.lane.b32.xlu0 %v1292_v36, %s1116_s10  ;;  %s1127_s10 = smov 106  }
  0xfc   : > { %467 = vrot.lane.b32.xlu1 %v1292_v36, %s1118_s11  ;;  %471 = vrot.lane.b32.xlu0 %v309_v35, %s1118_s11  ;;  %s1128_s11 = smov 112  }
 0x100   : > { %513 = vperm.xlu0 %992, %v510_v38  }
 0x142   : > { %v346_v39 = vpop.permute.xlu0 %345  ;;  %v325_v40 = vpop.permute.xlu1 %324 }
 0x143   : > { %355 = vst.msk [vmem:[#allocation3 + $0x40] sm:$0xff] %vm312_vm3, %v346_v39  ;;  %334 = vst.msk [vmem:[#allocation3 + $0x28] sm:$0xff] %vm312_vm3, %v325_v40 }
 0x146   : > { %v367_v41 = vpop.permute.xlu0 %366  ;;  %v342_v42 = vpop.permute.xlu1 %341 }
 0x147   : > { %376 = vst.msk [vmem:[#allocation3 + $0x58] sm:$0xff] %vm312_vm3, %v367_v41 }
 0x14a   : > { %v388_v43 = vpop.permute.xlu0 %387  ;;  %v384_v44 = vpop.permute.xlu1 %383  ;;  %v488_v46 = vld [vmem:[#allocation3 + $0x28] sm:$0xff]  ;;  %v491_v50 = vld [vmem:[#allocation3 + $0x40] sm:$0xff] }
 0x14b   : > { %397 = vst.msk [vmem:[#allocation3 + $0x70] sm:$0xff] %vm312_vm3, %v388_v43  ;;  %v895_v47 = vpack.c.bf16 %v488_v46, %v485_v45 }
 0x14d   : > { %896 = vmatpush3.bf16.msra.mxu1 %v895_v47 }
 0x14e   : > { %v409_v48 = vpop.permute.xlu0 %408  ;;  %v426_v49 = vpop.permute.xlu1 %425  ;;  %897 = vmatprep.subr.bf16.mxu1 %v1109_v34  ;;  %v494_v51 = vld [vmem:[#allocation3 + $0x58] sm:$0xff] }
 0x14f   : > { %418 = vst.msk [vmem:[#allocation3 + $0x88] sm:$0xff] %vm312_vm3, %v409_v48  ;;  %v898_v52 = vpack.c.bf16 %v494_v51, %v491_v50 }
 0x151   : > { %899 = vmatpush3.bf16.msra.mxu1 %v898_v52 }
 0x152   : > { %v344_v53 = vpop.permute.xlu1 %343  ;;  %v321_v54 = vpop.permute.xlu0 %320  ;;  %900 = vmatprep.subr.bf16.mxu1 %v1109_v34  ;;  %v497_v59 = vld [vmem:[#allocation3 + $0x70] sm:$0xff] }
 0x153   : > { %v348_v55 = vsel %vm347_vm5, %v342_v42, %v344_v53  ;;  %v349_v56 = vsel %vm347_vm5, %v344_v53, %v346_v39  ;;  %vm736_vm5 = vcmask 818176  }
 0x156   : > { %v365_v57 = vpop.permute.xlu1 %364  ;;  %v363_v58 = vpop.permute.xlu0 %362  ;;  %v500_v60 = vld [vmem:[#allocation3 + $0x88] sm:$0xff] }
 0x157   : > { %v370_v61 = vsel %vm368_vm6, %v365_v57, %v367_v41  ;;  %v369_v62 = vsel %vm368_vm6, %v363_v58, %v365_v57  ;;  %v901_v63 = vpack.c.bf16 %v500_v60, %v497_v59  ;;  %vm702_vm6 = vcmask 932864  }
 0x158   : > { %v882_v11 = vpack.c.bf16 %v370_v61, %v349_v56  ;;  %v884_v14 = vpack.c.bf16 %v369_v62, %v348_v55 }
 0x159   : > { %902 = vmatpush3.bf16.msra.mxu1 %v901_v63 }
 0x15a   : > { %v386_v1 = vpop.permute.xlu1 %385  ;;  %v323_v2 = vpop.permute.xlu0 %322  ;;  %903 = vmatprep.subr.bf16.mxu1 %v1109_v34 }
 0x15b   : > { %v390_v3 = vsel %vm389_vm7, %v384_v44, %v386_v1  ;;  %v391_v4 = vsel %vm389_vm7, %v386_v1, %v388_v43  ;;  %v327_v5 = vsel %vm326_vm8, %v321_v54, %v323_v2  ;;  %v328_v6 = vsel %vm326_vm8, %v323_v2, %v325_v40 }
 0x15c   : > { %v878_v7 = vpack.c.bf16 %v328_v6, %v1288_v33  ;;  %v880_v8 = vpack.c.bf16 %v327_v5, %v1292_v36  ;;  %v482_v36 = vld [vmem:[%s1426_s1] sm:$0xff]  ;;  %vm705_vm7 = vcmask 1048448  }
 0x15e   : > { %v407_v9 = vpop.permute.xlu1 %406  ;;  %v405_v10 = vpop.permute.xlu0 %404  ;;  %879 = vmatprep.subr.bf16.mxu0 %v878_v7 }
 0x15f   : > { %v412_v12 = vsel %vm410_vm9, %v407_v9, %v409_v48  ;;  %v411_v13 = vsel %vm410_vm9, %v405_v10, %v407_v9  ;;  %881 = vmatpush1.bf16.msra.mxu0 %v880_v8 }
 0x160   : > { %883 = vmatprep.subr.bf16.mxu0 %v882_v11  ;;  %v886_v17 = vpack.c.bf16 %v412_v12, %v391_v4  ;;  %v888_v20 = vpack.c.bf16 %v411_v13, %v390_v3 }
 0x162   : > { %v428_v15 = vpop.permute.xlu1 %427  ;;  %v430_v16 = vpop.permute.xlu0 %429 }
 0x163   : > { %v432_v18 = vsel %vm431_vm10, %v426_v49, %v428_v15  ;;  %v433_v19 = vsel %vm431_vm10, %v428_v15, %v430_v16  ;;  %439 = vst.msk [vmem:[#allocation3 + $0xa0] sm:$0xff] %vm312_vm3, %v430_v16  ;;  %885 = vmatpush1.bf16.msra.mxu0 %v884_v14 }
 0x164   : > { %887 = vmatprep.subr.bf16.mxu0 %v886_v17 }
 0x166   : > { %v449_v21 = vpop.permute.xlu1 %448  ;;  %v451_v22 = vpop.permute.xlu0 %450 }
 0x167   : > { %v454_v23 = vsel %vm452_vm11, %v449_v21, %v451_v22  ;;  %460 = vst.msk [vmem:[#allocation3 + $0xb8] sm:$0xff] %vm312_vm3, %v451_v22  ;;  %889 = vmatpush1.bf16.msra.mxu0 %v888_v20 }
 0x168   : > { %v890_v24 = vpack.c.bf16 %v454_v23, %v433_v19 }
 0x16a   : > { %v470_v25 = vpop.permute.xlu1 %469  ;;  %v447_v26 = vpop.permute.xlu0 %446  ;;  %891 = vmatprep.subr.bf16.mxu0 %v890_v24  ;;  %v503_v31 = vld [vmem:[#allocation3 + $0xa0] sm:$0xff] }
 0x16b   : > { %v453_v27 = vsel %vm452_vm11, %v447_v26, %v449_v21 }
 0x16c   : > { %v892_v28 = vpack.c.bf16 %v453_v27, %v432_v18 }
 0x16e   : > { %v468_v29 = vpop.permute.xlu1 %467  ;;  %v472_v30 = vpop.permute.xlu0 %471  ;;  %v506_v32 = vld [vmem:[#allocation3 + $0xb8] sm:$0xff]  ;;  %893 = vmatpush1.bf16.msra.mxu0 %v892_v28 }
 0x16f   : > { %v474_v33 = vsel %vm473_vm12, %v468_v29, %v470_v25  ;;  %v475_v34 = vsel %vm473_vm12, %v470_v25, %v472_v30  ;;  %481 = vst.msk [vmem:[#allocation3 + $0xd0] sm:$0xff] %vm312_vm3, %v472_v30  ;;  %v904_v35 = vpack.c.bf16 %v506_v32, %v503_v31  ;;  %vm690_vm3 = vcmask 786048  }
 0x170   : > { %536 = vmatprep.subr.mxu0 %v475_v34 }
 0x171   : > { %905 = vmatpush3.bf16.msra.mxu1 %v904_v35 }
 0x172   : > { %873 = vmatprep.subr.mxu1 %v1092_v0  ;;  %537 = vmatpush1.msra.mxu0 %v474_v33 }
 0x173   : > { %838 = vmatmul.mubr.msk.f32.vlgmr.msra.gmra.mrb[0].mxu0 %vm516_vm13, %v482_v36 }
 0x176   : > { %v509_v37 = vld [vmem:[#allocation3 + $0xd0] sm:$0xff] }
 0x177   : > { %874 = vmatpush3.msra.mxu1 %v509_v37 }
 0x178   : > { %876 = vmatmul.mubr.msk.f32.vlgmr.msra.gmra.mrb[0].mxu1 %vm516_vm13, %v482_v36 }
 0x17f   : > { %v514_v38 = vpop.permute.xlu0 %513 }
 0x246   : > { %v586_v39 = vpop.f32.mrb[0].mxu0 }
 0x247   : > { %v587_v40 = vadd.f32 %v586_v39, %v514_v38  ;;  %v588_v41 = vpop.f32.mrb[1].mxu0 }
 0x248   : > { %v589_v46 = vadd.f32 %v588_v41, %v514_v38 }
 0x249   : > { %v661_v42 = vmax.f32 %v587_v40, 0.0 }
 0x24a   : > { %v662_v47 = vmax.f32 %v589_v46, 0.0 }
 0x24b   : > { %v657_v43 = vpop.f32.mrb[0].mxu1  ;;  %667 = vrot.lane.b32.xlu1 %v661_v42, %s1110_s9  ;;  %665 = vst.msk [vmem:[%s1342_s27] sm:$0xff] %vm664_vm14, %v661_v42  ;;  %s1125_s9 = smov 118  }
 0x24c   : > { %v658_v0 = vadd.f32 %v657_v43, %v514_v38  ;;  %v877_v44 = vpop.f32.mrb[1].mxu1 }
 0x24e   : > { %v663_v45 = vmax.f32 %v658_v0, 0.0 }
 0x24f   : > { %672 = vrot.lane.b32.xlu1 %v661_v42, %s1120_s28 }
 0x250   : > { %734 = vrot.lane.b32.xlu0 %v663_v45, %s1121_s30 }
 0x253   : > { %677 = vrot.lane.b32.xlu1 %v661_v42, %s1122_s5  ;;  %s1132_s5 = smov [#allocation7]  }
 0x254   : > { %698 = vrot.lane.b32.xlu0 %v661_v42, %s1123_s4 }
 0x257   : > { %682 = vrot.lane.b32.xlu1 %v661_v42, %s1124_s23 }
 0x258   : > { %711 = vrot.lane.b32.xlu0 %v662_v47, %s1112_s6  ;;  %s1131_s6 = smov 98  }
 0x25b   : > { %687 = vrot.lane.b32.xlu1 %v661_v42, %s1125_s9 }
 0x25c   : > { %715 = vrot.lane.b32.xlu0 %v662_v47, %s1114_s7  ;;  %s846_s7 = sshll.u32 %s1174_s16, 8  ;;  %s745_s16 = scalar_lea.sflag [#allocation6], %s1258_s29 }
 0x25d   : > { %s1379_s28 = scalar_lea.hbm %s1428_s3, %s846_s7 }
 0x25f   : > { %692 = vrot.lane.b32.xlu1 %v661_v42, %s1126_s8 }
 0x260   : > { %719 = vrot.lane.b32.xlu0 %v662_v47, %s1127_s10 }
 0x263   : > { %707 = vrot.lane.b32.xlu1 %v662_v47, %s1128_s11 }
 0x264   : > { %723 = vrot.lane.b32.xlu0 %v662_v47, %s1129_s17 }
 0x267   : > { %732 = vrot.lane.b32.xlu1 %v662_v47, %s1121_s30  ;;  %s1023_s30 = scalar_lea.vmem %s1381_s20, 256 }
 0x268   : > { %727 = vrot.lane.b32.xlu0 %v662_v47, %s1130_s19  ;;  %p1024_p6 = scmp.ne.s32.totalorder %s1381_s20, %s1023_s30 }
 0x26a   : > { %p1025_p12 = pnand %p1024_p6, %p1437_p11 }
 0x26b   : > { %700 = vrot.lane.b32.xlu1 %v662_v47, %s1123_s4  ;;  %s1027_s4 = sshll.u32 %s1132_s5, 4  ;;  %s1028_s4 = int_to_ptr.vmem [resolvable:$false] %s1027_s4 }
 0x26c   : > { %740 = vrot.lane.b32.xlu0 %v663_v45, %s1131_s6  ;;  %p1026_p13 = pneg %p1025_p12  ;;  %s1029_s23 = scalar_lea.vmem %s1028_s4, 512 }
 0x26d   : > { %p1030_p7 = scmp.lt.s32.totalorder %s1381_s20, %s1028_s4  ;;  %p1031_p10 = scmp.lt.s32.totalorder %s1029_s23, %s1023_s30 }
 0x26f   : > { %p1032_p2 = por %p1031_p10, %p1030_p7 }
 0x271   : > { %p1033_p4 = pnand %p1032_p2, %p1026_p13 }
 0x2bd   : > { %v668_v48 = vpop.permute.xlu1 %667 }
 0x2be   : > { %671 = vst.msk [vmem:[%s1342_s27] sm:$0xff] %vm670_vm15, %v668_v48 }
 0x2c1   : > { %v673_v49 = vpop.permute.xlu1 %672 }
 0x2c2   : > { %v735_v50 = vpop.permute.xlu0 %734  ;;  %676 = vst.msk [vmem:[%s1342_s27] sm:$0xff] %vm675_vm0, %v673_v49 }
 0x2c5   : > { %v678_v51 = vpop.permute.xlu1 %677 }
 0x2c6   : > { %v699_v52 = vpop.permute.xlu0 %698  ;;  %681 = vst.msk [vmem:[%s1342_s27] sm:$0xff] %vm680_vm1, %v678_v51 }
 0x2c9   : > { %v683_v53 = vpop.permute.xlu1 %682 }
 0x2ca   : > { %v712_v54 = vpop.permute.xlu0 %711  ;;  %686 = vst.msk [vmem:[%s1342_s27] sm:$0xff] %vm685_vm2, %v683_v53 }
 0x2cd   : > { %v688_v55 = vpop.permute.xlu1 %687 }
 0x2ce   : > { %v716_v56 = vpop.permute.xlu0 %715  ;;  %691 = vst.msk [vmem:[%s1342_s27] sm:$0xff] %vm690_vm3, %v688_v55 }
 0x2d1   : > { %v693_v57 = vpop.permute.xlu1 %692 }
 0x2d2   : > { %v720_v58 = vpop.permute.xlu0 %719  ;;  %696 = vst.msk [vmem:[%s1342_s27] sm:$0xff] %vm695_vm4, %v693_v57 }
 0x2d5   : > { %v708_v59 = vpop.permute.xlu1 %707 }
 0x2d6   : > { %v724_v60 = vpop.permute.xlu0 %723  ;;  %710 = vst.msk [vmem:[%s1342_s27 + $0x8] sm:$0xff] %vm664_vm14, %v708_v59 }
 0x2d7   : > { %714 = vst.msk [vmem:[%s1342_s27 + $0x8] sm:$0xff] %vm670_vm15, %v712_v54 }
 0x2d8   : > { %718 = vst.msk [vmem:[%s1342_s27 + $0x8] sm:$0xff] %vm675_vm0, %v716_v56 }
 0x2d9   : > { %722 = vst.msk [vmem:[%s1342_s27 + $0x8] sm:$0xff] %vm680_vm1, %v720_v58  ;;  %v733_v61 = vpop.permute.xlu1 %732 }
 0x2da   : > { %v728_v62 = vpop.permute.xlu0 %727  ;;  %726 = vst.msk [vmem:[%s1342_s27 + $0x8] sm:$0xff] %vm685_vm2, %v724_v60  ;;  %v737_v63 = vsel %vm736_vm5, %v733_v61, %v735_v50 }
 0x2db   : > { %730 = vst.msk [vmem:[%s1342_s27 + $0x8] sm:$0xff] %vm690_vm3, %v728_v62 }
 0x2dc   : > { %739 = vst.msk [vmem:[%s1342_s27 + $0x8] sm:$0xff] %vm695_vm4, %v737_v63 }
 0x2dd   : > { %v701_v1 = vpop.permute.xlu1 %700 }
 0x2de   : > { %v741_v2 = vpop.permute.xlu0 %740  ;;  %v703_v3 = vsel %vm702_vm6, %v699_v52, %v701_v1 }
 0x2df   : > { %706 = vst.msk [vmem:[%s1342_s27] sm:$0xff] %vm705_vm7, %v703_v3  ;;  %743 = vst.msk [vmem:[%s1342_s27 + $0x8] sm:$0xff] %vm705_vm7, %v741_v2 }
 0x2e0   : > { %1036 = shalt.err (!%p1033_p4)
}
 0x2e1   : > { %s1037_s29 = scalar_lea.hbm %s1379_s28, 256  ;;  %s1041_s8 = scalar_lea.hbm %s1428_s3, 512 }
 0x2e2   : > { %p1038_p5 = scmp.ne.s32.totalorder %s1379_s28, %s1037_s29  ;;  %p1042_p0 = scmp.lt.u32.totalorder %s1379_s28, %s1428_s3 }
 0x2e3   : > { %p1043_p1 = scmp.lt.u32.totalorder %s1041_s8, %s1037_s29  ;;  %p1045_p6 = scmp.lt.u32.totalorder %s1037_s29, %s1379_s28 }
 0x2e4   : > { %p1039_p8 = pnand %p1038_p5, %p1437_p11 }
 0x2e5   : > { %p1044_p3 = por %p1043_p1, %p1042_p0 }
 0x2e6   : > { %p1040_p9 = pneg %p1039_p8 }
 0x2e7   : > { %p1046_p12 = por %p1045_p6, %p1044_p3 }
 0x2e9   : > { %p1047_p13 = pnand %p1046_p12, %p1040_p9 }
 0x2eb   : > { %1050 = shalt.err (!%p1047_p13)
}
 0x2ec   : > { %908 = dma.vmem_to_hbm [thread:$0]  (%p1437_p11), %s1381_s20, 256, %s1379_s28, %s745_s16  }
 0x2ed PF: > { %s771_s17 = sand.u32 1, %s1077_s12   ;;  %p1438_p7 = scmp.ne.s32.totalorder %s1433_s25, 0 }
 0x2ee   : > { %p1439_p10 = scmp.ge.s32.totalorder %s1089_s15, 2  ;;  %s772_s19 = scalar_lea.sflag [#allocation6], %s771_s17 }
 0x2f0   : > { %p915_p2 = pnand %p1439_p10, %p1438_p7 }
 0x2f2   : > { %1072 = dma.done.wait (!%p915_p2), %s772_s19, 256  }
 0x2f3   : > { %1074 = vsyncadd (!%p915_p2), %s772_s19, 4294967040  ;;  %p16_p4 = scmp.ge.s32.totalorder %s1178_s18, 4   ;;  %s1440_s12 = smov %s1081_s13 }
 0x2f4   : > { %s1441_s13 = smov %s1085_s14  ;;  %s1442_s14 = smov %s1190_s21 }
 0x2f5   : > { %s1443_s15 = smov %s1178_s18  ;;  %18 = sbr.rel (!%p16_p4) target bundleno = 5 (0x5), region = 77 }
 0x2fc   :  { %777 = vsyncpa [#allocation5], 1 }
 0x2fd   :  { %779 = vsyncpa [#allocation5 + $0x1], 1 }
 0x2fe   :  { %780 = vsyncpa [#allocation6], 1 }
 0x2ff   :  { %782 = vsyncpa [#allocation6 + $0x1], 1 }

</bundles_post_ra>
